<compile_context>
chip_gen: v7x
topology: tpu7x:2x2x1
jax: 0.10.0
libtpu: 0.0.40
codegen_flags: <defaults>
</compile_context>

<pallas_src>
import math
from itertools import groupby

import numpy as np
import jax
import jax.numpy as jnp
from jax.experimental import pallas as pl
from jax.experimental.pallas import tpu as pltpu


# ----------------------------------------------------------------------------
# Pallas kernel: elementwise threshold (the vectorizable hot path)
# ----------------------------------------------------------------------------
_LANES = 512          # lane width of each block (multiple of 128 -> lane-dense stores)
_MAX_ROW_TILE = 2048  # rows per block (multiple of 32): 4 MiB f32 in + 1 MiB i8 out


def _threshold_kernel(thr_ref, x_ref, o_ref):
    # thr_ref: (1,) f32 scalar in SMEM; x_ref: (row_tile, _LANES) f32 in VMEM.
    o_ref[...] = (x_ref[...] > thr_ref[0]).astype(jnp.int8)


def _choose_row_tile(rows: int) -> int:
    """Row tile: multiple of 32, <= _MAX_ROW_TILE, and grid >= 2 whenever
    rows >= 64 (dual-TC sharding on v7x + DMA double-buffering everywhere)."""
    if rows < 64:
        return rows                                   # one full-extent block (always legal)
    half = (-(-rows // 2) + 31) // 32 * 32            # round_up(cdiv(rows, 2), 32)
    return min(_MAX_ROW_TILE, half)


@jax.jit
def _threshold_device(x, thr):
    """Returns (main_i8, tail_i8) such that concat(main.ravel(), tail) equals
    (x.ravel() > thr) as int8 {0,1}. No padding copies are made."""
    n = math.prod(x.shape)
    flat = jnp.reshape(x, (n,))
    rows = n // _LANES
    n_main = rows * _LANES
    thr = jnp.asarray(thr, dtype=jnp.float32)

    if rows > 0:
        row_tile = _choose_row_tile(rows)
        main = jnp.reshape(flat[:n_main], (rows, _LANES))   # contiguous prefix: layout no-op
        out_main = pl.pallas_call(
            _threshold_kernel,
            out_shape=jax.ShapeDtypeStruct((rows, _LANES), jnp.int8),
            grid=(pl.cdiv(rows, row_tile),),
            in_specs=[
                pl.BlockSpec(memory_space=pltpu.MemorySpace.SMEM),    # threshold scalar
                pl.BlockSpec((row_tile, _LANES), lambda i: (i, 0)),   # input tile
            ],
            out_specs=pl.BlockSpec((row_tile, _LANES), lambda i: (i, 0)),
            compiler_params=pltpu.CompilerParams(
                dimension_semantics=("parallel",),
                vmem_limit_bytes=32 * 1024 * 1024,   # safe on v5e (16 MiB default) & v7x (64 MiB phys)
            ),
        )(jnp.reshape(thr, (1,)), main)
    else:
        out_main = jnp.zeros((0, _LANES), dtype=jnp.int8)

    # Tail (< _LANES elements): trivial jnp compare, negligible traffic.
    out_tail = (flat[n_main:] > thr).astype(jnp.int8)
    return out_main, out_tail


# ----------------------------------------------------------------------------
# Host-side run-length / stability smoothing (exact port of the reference).
# TODO(synk): the groupby-based RLE + stability resolution is data-dependent
# Python list control flow (the reference itself calls `.tolist()`); it has no
# clean Pallas equivalent and is kept on the host, matching original semantics.
# ----------------------------------------------------------------------------
def count_same_pair(nums):
    result = []
    for num in nums:
        result.append([[i, sum(1 for _ in group)] for i, group in groupby(num)])
    return result


def check_silence_or_voice(active, pair):
    value, num_consecutive_occurrences = pair[0]
    check = False
    if len(pair) == 1:
        check = True
        if value:
            active = np.ones(num_consecutive_occurrences, dtype=np.float32)
        else:
            active = np.zeros(num_consecutive_occurrences, dtype=np.float32)
    return active, check


def resolve_instability(i, pair, stability, sample_rate, actived, not_actived, active):
    while i < len(pair) and pair[i][1] < int(stability * sample_rate):
        value, num_consecutive_occurrences = pair[i]
        if value:
            actived += num_consecutive_occurrences
            i += 1
        else:
            not_actived += num_consecutive_occurrences
            i += 1
    if actived + not_actived < int(stability * sample_rate) and len(active) > 0:
        if active[-1][0] == 1:
            active.append(np.ones(actived + not_actived, dtype=np.float32))
        else:
            active.append(np.zeros(actived + not_actived, dtype=np.float32))
    elif actived + not_actived < int(stability * sample_rate) and len(active) == 0:
        active.append(np.zeros(actived + not_actived, dtype=np.float32))
    elif actived > not_actived:
        active.append(np.ones(actived + not_actived, dtype=np.float32))
    else:
        active.append(np.zeros(actived + not_actived, dtype=np.float32))
    return active, i


def transform_to_binary_sequence(pairs, stability, sample_rate):
    batch_active = []
    for pair in pairs:
        active = []
        active, check = check_silence_or_voice(active, pair)
        if check:
            # Reference short-circuits the whole batch here (preserved as-is).
            return active
        i = 0
        while i < len(pair):
            value, num_consecutive_occurrences = pair[i]
            actived = 0
            not_actived = 0
            if num_consecutive_occurrences < int(stability * sample_rate):
                active, i = resolve_instability(
                    i, pair, stability, sample_rate, actived, not_actived, active
                )
            else:
                if value:
                    active.append(np.ones(pair[i][1], dtype=np.float32))
                else:
                    active.append(np.zeros(pair[i][1], dtype=np.float32))
                i += 1
        batch_active.append(np.hstack(active))
    batch_active = np.vstack(batch_active)[:, None, :]  # unsqueeze(1) -> (B, 1, T)
    return batch_active


# ----------------------------------------------------------------------------
# Module-equivalent wrapper
# ----------------------------------------------------------------------------
class Binarize:
    """JAX/Pallas port of egs/tse/local/binarize.py::Binarize (mode='asteroid')."""

    def __init__(self, threshold=0.5, stability=0.1, sample_rate=8000, mode="asteroid"):
        self.threshold = threshold
        self.stability = stability
        self.sample_rate = sample_rate
        self.mode = mode.lower()
        if self.mode != "asteroid":
            # TODO(synk): 'moving_average' mode depends on MovingAverage1D, which is
            # not defined in the provided source; only 'asteroid' is implemented.
            raise NotImplementedError

    def __call__(self, x):
        # x: (B, 1, T) — PyTorch NCL convention; C == 1 (mirrors x.squeeze(1)).
        x = jnp.asarray(x)
        B, C, T = x.shape
        assert C == 1, "Binarize expects (B, 1, T) input"

        # Single jitted device dispatch: threshold (Pallas) + tiny tail compare.
        out_main, out_tail = _threshold_device(x, self.threshold)
        out_main, out_tail = jax.block_until_ready((out_main, out_tail))

        # Host-side assembly (free numpy views) + `.squeeze(1).tolist()` mirror.
        flat = np.concatenate(
            [np.asarray(out_main).reshape(-1), np.asarray(out_tail)])
        active_list = flat.reshape(B, T).astype(bool).tolist()

        pairs = count_same_pair(active_list)
        out = transform_to_binary_sequence(pairs, self.stability, self.sample_rate)
        return jnp.asarray(np.asarray(out, dtype=np.float32))


if __name__ == "__main__":
    key = jax.random.PRNGKey(0)
    # 2 x 16400 samples -> 64 full (512-lane) rows through the Pallas kernel
    # (grid of 2 blocks) plus a 32-element jnp tail.
    B, C, T = 2, 1, 16400
    x = jax.random.uniform(key, (B, C, T), dtype=jnp.float32)  # values in [0, 1)

    binarizer = Binarize(threshold=0.5, stability=0.1, sample_rate=8000)
    result = binarizer(x)
    result = jax.block_until_ready(result)

    rnp = np.asarray(result)
    assert rnp.shape == (B, 1, T)
    assert np.all((rnp == 0.0) | (rnp == 1.0))

    # Verify the Pallas threshold path against a pure numpy reference.
    out_main, out_tail = _threshold_device(x, 0.5)
    out_main, out_tail = jax.block_until_ready((out_main, out_tail))
    got = np.concatenate([np.asarray(out_main).reshape(-1), np.asarray(out_tail)])
    ref = (np.asarray(x).reshape(-1) > 0.5).astype(np.int8)
    np.testing.assert_array_equal(got, ref)

    print("KERNEL_OK")
</pallas_src>

<mosaic_0001>
module attributes {stable_mosaic.version = 11 : i64} {
  func.func @_threshold_kernel(%arg0: i32, %arg1: memref<1xf32, #tpu.memory_space<smem>>, %arg2: memref<32x512xf32, #tpu.memory_space<vmem>>, %arg3: memref<32x512xi8, #tpu.memory_space<vmem>>) attributes {dimension_semantics = [#tpu.dimension_semantics<parallel>], iteration_bounds = array<i64: 2>, scalar_prefetch = 0 : i64, scratch_operands = 0 : i64, tpu.core_type = #tpu.core_type<tc>, window_params = [{transform_indices = @transform_0, window_bounds = array<i64: 1>}, {transform_indices = @transform_1, window_bounds = array<i64: 32, 512>}, {transform_indices = @transform_2, window_bounds = array<i64: 32, 512>}]} {
    %c0 = arith.constant 0 : index
    %c0_0 = arith.constant 0 : index
    %0 = vector.load %arg2[%c0, %c0_0] : memref<32x512xf32, #tpu.memory_space<vmem>>, vector<32x512xf32>
    %c0_1 = arith.constant 0 : index
    %1 = memref.load %arg1[%c0_1] : memref<1xf32, #tpu.memory_space<smem>>
    %2 = vector.broadcast %1 : f32 to vector<32x512xf32>
    %3 = arith.cmpf ogt, %0, %2 : vector<32x512xf32>
    %4 = arith.extui %3 : vector<32x512xi1> to vector<32x512xi8>
    %c0_2 = arith.constant 0 : index
    %c0_3 = arith.constant 0 : index
    %5 = vector.load %arg3[%c0_2, %c0_3] : memref<32x512xi8, #tpu.memory_space<vmem>>, vector<32x512xi8>
    tpu.vector_store %arg3[%c0_2, %c0_3], %4 {strides = array<i32>} : memref<32x512xi8, #tpu.memory_space<vmem>>, vector<32x512xi8>,
    return
  }
  func.func @transform_0(%arg0: i32) -> i32 {
    %c0_i32 = arith.constant 0 : i32
    %c0_i32_0 = arith.constant 0 : i32
    return %c0_i32 : i32
  }
  func.func @transform_1(%arg0: i32) -> (i32, i32) {
    %c0_i32 = arith.constant 0 : i32
    %c0_i32_0 = arith.constant 0 : i32
    return %arg0, %c0_i32 : i32, i32
  }
  func.func @transform_2(%arg0: i32) -> (i32, i32) {
    %c0_i32 = arith.constant 0 : i32
    %c0_i32_0 = arith.constant 0 : i32
    return %arg0, %c0_i32 : i32, i32
  }
}

</mosaic_0001>

<bundles_post_ra>
// kernel: _threshold_device.1
= control target key start
LH: loop header
LB: loop body
LE: loop exit
PB: predicated region body
PF: predicated region fallthrough
CT: control target
= control target key end

     0   :  { %s538_s0 = inlined_call_operand.<no memory space> [shape: f32[1], index: 0, kind: input, shape index: {}]   ;;  %s539_s1 = inlined_call_operand.vmem [shape: f32[64,512], index: 1, kind: input, shape index: {}]   ;;  %s540_s2 = inlined_call_operand.hbm [shape: s8[64,512], index: 2, kind: output, shape index: {}]  }
   0x1   :  { %7 = sst [smem:[#allocation2]] %s538_s0 }
   0x2   :  { %8 = vsyncpa [#allocation4], 0 }
   0x3   :  { %10 = vsyncpa [#allocation4 + $0x1], 0  ;;  %s417_s11 = smov 0   ;;  %s419_s12 = smov 0  }
   0x4   :  { %s421_s13 = smov 0   ;;  %s423_s14 = smov 0  }
   0x5 LB: > { %s438_s0 = sadd.s32 4294967295, %s395_s14   ;;  %s278_s15 = sadd.s32 4294967294, %s395_s14   ;;  %s395_s14 = sphi %s423_s14, %s546_s14   ;;  %s391_s13 = sphi %s421_s13, %s545_s13   ;;  %s387_s12 = sphi %s419_s12, %s544_s12   ;;  %s383_s11 = sphi %s417_s11, %s543_s11  }
   0x6   : > { %s442_s16 = sadd.s32 1, %s395_s14   ;;  %s70_s17 = sadd.s32 1, %s391_s13 }
   0x7   : > { %s67_s18 = ssub.s32 %s395_s14, %s442_s16  ;;  %p80_p0 = scmp.ne.s32.totalorder %s391_s13, %s387_s12 }
   0x8   : > { %p68_p1 = scmp.eq.s32.totalorder %s67_s18, 0  ;;  %p81_p2 = scmp.eq.s32.totalorder %s438_s0, 1 }
   0x9   : > { %p86_p3 = scmp.ne.s32.totalorder %s387_s12, %s383_s11  ;;  %p87_p4 = scmp.eq.s32.totalorder %s278_s15, 1 }
   0xa   : > { %s453_s19 = scalar_select %p68_p1, %s391_s13, %s70_s17  }
   0xb   : > { %p455_p5 = por %p81_p2, %p80_p0  ;;  %p459_p6 = por %p87_p4, %p86_p3 }
   0xc   : > { %p281_p7 = scmp.ge.s32.totalorder %s395_s14, 1  ;;  %p118_p8 = scmp.lt.s32.totalorder %s395_s14, 3 }
   0xe   : > { %p119_p9 = pnand %p281_p7, %p118_p8 }
   0xf   : > { %s283_s22 = sshll.u32 (!%p119_p9), %s438_s0, 2  ;;  %s166_s23 = sld [smem:[#allocation2]] (!%p119_p9)  ;;  %v397_v13 = vmov (!%p119_p9), 0  }
  0x10   : > { %122 = sbr.rel (%p119_p9) target bundleno = 56 (0x38), region = 28  ;;  %p142_p10 = scmp.lt.s32.totalorder (!%p119_p9), %s283_s22, 7 }
  0x11   : > { %s138_s24 = sand.u32 (!%p119_p9), 1, %s387_s12   ;;  %s292_s3 = sshll.u32 (!%p119_p9), %s438_s0, 9 }
  0x12   : > { %s282_s29 = sshll.u32 (!%p119_p9), %s138_s24, 5  ;;  %s494_s7 = scalar_lea.hbm (!%p119_p9), %s540_s2, %s292_s3 }
  0x13   : > { %s140_s30 = scalar_lea.vmem (!%p119_p9), [#allocation3], %s282_s29  ;;  %s205_s8 = scalar_lea.sflag (!%p119_p9), [#allocation4], %s138_s24 }
  0x14   : > { %s219_s4 = sshll.u32 (!%p119_p9), %s140_s30, 4  ;;  %s398_s10 = smov (!%p119_p9), [#allocation3]   ;;  %s496_s4 = int_to_ptr.vmem [resolvable:$true] %s219_s4 }
  0x15   : > { %v167_v4 = vstv (!%p119_p9), %s166_s23  ;;  %s333_s9 = scalar_lea.vmem (!%p119_p9), %s496_s4, 512  ;;  %s337_s0 = sshll.u32 (!%p119_p9), %s398_s10, 4  ;;  %s338_s0 = int_to_ptr.vmem [resolvable:$false] %s337_s0 }
  0x16   : > { %p334_p11 = scmp.ne.s32.totalorder (!%p119_p9), %s496_s4, %s333_s9  ;;  %s339_s15 = scalar_lea.vmem (!%p119_p9), %s338_s0, 1024 }
  0x17   : > { %s548_s22 = smov (!%p142_p10, %s283_s22), 7  ;;  %p340_p0 = scmp.lt.s32.totalorder %s496_s4, %s338_s0 }
  0x18   : > { %s291_s25 = sshll.u32 %s548_s22, 5  ;;  %p335_p12 = pnand %p334_p11, %p455_p5 }
  0x19   : > { %s470_s28 = scalar_lea.vmem %s539_s1, %s291_s25  ;;  %p341_p1 = scmp.lt.s32.totalorder %s339_s15, %s333_s9 }
  0x1a   : > { %v150_v0 = vld [vmem:[%s470_s28] sm:$0xff]  ;;  %v151_v5 = vld [vmem:[%s470_s28 + $0x8] sm:$0xff]  ;;  %v152_v9 = vld [vmem:[%s470_s28 + $0x10] sm:$0xff]  ;;  %p336_p13 = pneg %p335_p12 }
  0x1b   : > { %v154_v1 = vld [vmem:[%s470_s28 + $0x20] sm:$0xff]  ;;  %v155_v6 = vld [vmem:[%s470_s28 + $0x28] sm:$0xff]  ;;  %vm168_vm0 = vcmp.gt.f32.partialorder %v150_v0, %v167_v4  ;;  %vm169_vm5 = vcmp.gt.f32.partialorder %v151_v5, %v167_v4  ;;  %v156_v10 = vld [vmem:[%s470_s28 + $0x30] sm:$0xff]  ;;  %vm170_vm12 = vcmp.gt.f32.partialorder %v152_v9, %v167_v4  ;;  %p342_p2 = por %p341_p1, %p340_p0 }
  0x1c   : > { %v158_v2 = vld [vmem:[%s470_s28 + $0x40] sm:$0xff]  ;;  %vm172_vm1 = vcmp.gt.f32.partialorder %v154_v1, %v167_v4  ;;  %v159_v7 = vld [vmem:[%s470_s28 + $0x48] sm:$0xff]  ;;  %vm173_vm6 = vcmp.gt.f32.partialorder %v155_v6, %v167_v4  ;;  %v160_v11 = vld [vmem:[%s470_s28 + $0x50] sm:$0xff]  ;;  %vm174_vm13 = vcmp.gt.f32.partialorder %v156_v10, %v167_v4 }
  0x1d   : > { %v162_v3 = vld [vmem:[%s470_s28 + $0x60] sm:$0xff]  ;;  %vm176_vm2 = vcmp.gt.f32.partialorder %v158_v2, %v167_v4  ;;  %v163_v8 = vld [vmem:[%s470_s28 + $0x68] sm:$0xff]  ;;  %vm184_vm4 = vmpackc.low %vm172_vm1, %vm168_vm0  ;;  %vm177_vm8 = vcmp.gt.f32.partialorder %v159_v7, %v167_v4  ;;  %vm178_vm15 = vcmp.gt.f32.partialorder %v160_v11, %v167_v4  ;;  %p343_p3 = pnand %p342_p2, %p336_p13 }
  0x1e   : > { %vm180_vm3 = vcmp.gt.f32.partialorder %v162_v3, %v167_v4  ;;  %vm181_vm9 = vcmp.gt.f32.partialorder %v163_v8, %v167_v4  ;;  %v164_v12 = vld [vmem:[%s470_s28 + $0x70] sm:$0xff]  ;;  %vm187_vm11 = vmpackc.low %vm173_vm6, %vm169_vm5  ;;  %v153_v15 = vld [vmem:[%s470_s28 + $0x18] sm:$0xff] }
  0x1f   : > { %vm185_vm7 = vmpackc.low %vm180_vm3, %vm176_vm2  ;;  %v157_v16 = vld [vmem:[%s470_s28 + $0x38] sm:$0xff]  ;;  %vm182_vm0 = vcmp.gt.f32.partialorder %v164_v12, %v167_v4  ;;  %vm171_vm3 = vcmp.gt.f32.partialorder %v153_v15, %v167_v4 }
  0x20   : > { %vm186_vm10 = vmpackc.even %vm185_vm7, %vm184_vm4  ;;  %v161_v17 = vld [vmem:[%s470_s28 + $0x58] sm:$0xff]  ;;  %vm175_vm4 = vcmp.gt.f32.partialorder %v157_v16, %v167_v4 }
  0x21   : > { %v196_v14 = vsel %vm186_vm10, 16843009, %v397_v13  ;;  %vm188_vm14 = vmpackc.low %vm181_vm9, %vm177_vm8  ;;  %v165_v18 = vld [vmem:[%s470_s28 + $0x78] sm:$0xff]  ;;  %vm179_vm6 = vcmp.gt.f32.partialorder %v161_v17, %v167_v4 }
  0x22   : > { %200 = vst [vmem:[%s140_s30] sm:$0xff] %v196_v14  ;;  %vm189_vm1 = vmpackc.even %vm188_vm14, %vm187_vm11  ;;  %vm183_vm7 = vcmp.gt.f32.partialorder %v165_v18, %v167_v4 }
  0x23   : > { %v197_v19 = vsel %vm189_vm1, 16843009, %v397_v13  ;;  %vm190_vm2 = vmpackc.low %vm174_vm13, %vm170_vm12 }
  0x24   : > { %201 = vst [vmem:[%s140_s30 + $0x8] sm:$0xff] %v197_v19  ;;  %vm191_vm5 = vmpackc.low %vm182_vm0, %vm178_vm15 }
  0x25   : > { %vm192_vm10 = vmpackc.even %vm191_vm5, %vm190_vm2 }
  0x26   : > { %v198_v20 = vsel %vm192_vm10, 16843009, %v397_v13  ;;  %vm193_vm8 = vmpackc.low %vm175_vm4, %vm171_vm3 }
  0x27   : > { %202 = vst [vmem:[%s140_s30 + $0x10] sm:$0xff] %v198_v20  ;;  %vm194_vm9 = vmpackc.low %vm183_vm7, %vm179_vm6 }
  0x28   : > { %vm195_vm11 = vmpackc.even %vm194_vm9, %vm193_vm8 }
  0x29   : > { %v199_v21 = vsel %vm195_vm11, 16843009, %v397_v13 }
  0x2a   : > { %203 = vst [vmem:[%s140_s30 + $0x18] sm:$0xff] %v199_v21 }
  0x2b   : > { %346 = shalt.err (!%p343_p3)
}
  0x2c   : > { %s347_s17 = scalar_lea.hbm %s494_s7, 512  ;;  %s351_s23 = scalar_lea.hbm %s540_s2, 1024 }
  0x2d   : > { %p348_p4 = scmp.ne.s32.totalorder %s494_s7, %s347_s17  ;;  %p352_p9 = scmp.lt.u32.totalorder %s494_s7, %s540_s2 }
  0x2e   : > { %p353_p10 = scmp.lt.u32.totalorder %s351_s23, %s347_s17  ;;  %p355_p12 = scmp.lt.u32.totalorder %s347_s17, %s494_s7 }
  0x2f   : > { %p349_p7 = pnand %p348_p4, %p455_p5 }
  0x30   : > { %p354_p11 = por %p353_p10, %p352_p9 }
  0x31   : > { %p350_p8 = pneg %p349_p7 }
  0x32   : > { %p356_p13 = por %p355_p12, %p354_p11 }
  0x34   : > { %p357_p0 = pnand %p356_p13, %p350_p8 }
  0x36   : > { %360 = shalt.err (!%p357_p0)
}
  0x37   : > { %293 = dma.vmem_to_hbm [thread:$0]  (%p455_p5), %s496_s4, 512, %s494_s7, %s205_s8  }
  0x38 PF: > { %p299_p1 = scmp.ge.s32.totalorder %s395_s14, 2  ;;  %s231_s26 = sand.u32 1, %s383_s11  }
  0x39   : > { %s232_s27 = scalar_lea.sflag [#allocation4], %s231_s26 }
  0x3a   : > { %p296_p2 = pnand %p299_p1, %p459_p6 }
  0x3c   : > { %378 = dma.done.wait (!%p296_p2), %s232_s27, 512  }
  0x3d   : > { %380 = vsyncadd (!%p296_p2), %s232_s27, 4294966784  ;;  %p13_p3 = scmp.ge.s32.totalorder %s442_s16, 4   ;;  %s543_s11 = smov %s387_s12 }
  0x3e   : > { %s544_s12 = smov %s391_s13  ;;  %s545_s13 = smov %s453_s19 }
  0x3f   : > { %s546_s14 = smov %s442_s16  ;;  %15 = sbr.rel (!%p13_p3) target bundleno = 5 (0x5), region = 63 }
  0x46   :  { %237 = vsyncpa [#allocation4], 1 }
  0x47   :  { %239 = vsyncpa [#allocation4 + $0x1], 1 }

</bundles_post_ra>
